<compile_context>
chip_gen: v5e
topology: v5e:2x2
jax: 0.10.0
libtpu: 0.0.40
codegen_flags: <defaults>
</compile_context>

<pallas_src>
import functools

import jax
import jax.numpy as jnp
from jax.experimental import pallas as pl
from jax.experimental.pallas import tpu as pltpu


def _mlp_kernel(x_ref, w1_ref, sc1_ref, sh1_ref, w2_ref, sc2_ref, sh2_ref,
                o_ref, v1_ref, v2_ref, *, inv_tau, v_threshold):
    # x_ref:   (1, tile_rows, C_in)   VMEM
    # w1_ref:  (C_in, H)              VMEM (resident)
    # sc1/sh1: (1, H)                 folded BN1 scale/shift
    # w2_ref:  (H, C_out)             VMEM (resident)
    # sc2/sh2: (1, C_out)             folded BN2 scale/shift
    # o_ref:   (1, tile_rows, C_out)
    # v1_ref:  (tile_rows, H)         LIF-1 membrane (carried across T)
    # v2_ref:  (tile_rows, C_out)     LIF-2 membrane (carried across T)
    t = pl.program_id(1)

    @pl.when(t == 0)
    def _():
        v1_ref[...] = jnp.zeros_like(v1_ref)
        v2_ref[...] = jnp.zeros_like(v2_ref)

    x = x_ref[0]  # (tile_rows, C_in)

    # fc1_linear + fc1_bn (folded affine)
    h = jnp.dot(x, w1_ref[...], preferred_element_type=jnp.float32)
    h = h * sc1_ref[...] + sh1_ref[...]

    # fc1_lif: charge, fire, hard-reset to 0
    v1 = v1_ref[...] + (h - v1_ref[...]) * inv_tau
    spk1 = (v1 >= v_threshold).astype(jnp.float32)
    v1_ref[...] = v1 * (1.0 - spk1)

    # fc2_linear + fc2_bn (folded affine)
    y = jnp.dot(spk1, w2_ref[...], preferred_element_type=jnp.float32)
    y = y * sc2_ref[...] + sh2_ref[...]

    # fc2_lif
    v2 = v2_ref[...] + (y - v2_ref[...]) * inv_tau
    spk2 = (v2 >= v_threshold).astype(jnp.float32)
    v2_ref[...] = v2 * (1.0 - spk2)

    o_ref[0] = spk2.astype(o_ref.dtype)


def mlp_forward(x, w1, gamma1, beta1, mean1, var1,
                w2, gamma2, beta2, mean2, var2,
                *, tau=2.0, v_threshold=0.5, eps=1e-5, tile_rows=None):
    """Pallas equivalent of MLP(...).forward(x) (eval-mode BN, no bias, drop=0)."""
    T, B, N, C = x.shape
    H = w1.shape[0]          # torch layout: (hidden, in)
    C_out = w2.shape[0]      # torch layout: (out, hidden)
    rows = B * N

    if tile_rows is None:
        tile_rows = rows if rows <= 512 else 512
    assert rows % tile_rows == 0, (rows, tile_rows)

    x2 = x.reshape(T, rows, C).astype(jnp.float32)
    w1_t = jnp.asarray(w1, jnp.float32).T            # (C, H)
    w2_t = jnp.asarray(w2, jnp.float32).T            # (H, C_out)

    # Fold eval-mode BatchNorm1d into per-channel scale/shift.
    scale1 = (gamma1 / jnp.sqrt(var1 + eps)).astype(jnp.float32)
    shift1 = (beta1 - mean1 * scale1).astype(jnp.float32)
    scale2 = (gamma2 / jnp.sqrt(var2 + eps)).astype(jnp.float32)
    shift2 = (beta2 - mean2 * scale2).astype(jnp.float32)
    scale1, shift1 = scale1.reshape(1, H), shift1.reshape(1, H)
    scale2, shift2 = scale2.reshape(1, C_out), shift2.reshape(1, C_out)

    kernel = functools.partial(_mlp_kernel,
                               inv_tau=float(1.0 / tau),
                               v_threshold=float(v_threshold))

    grid = (rows // tile_rows, T)  # row tiles outer (parallel), time inner (carried state)

    out = pl.pallas_call(
        kernel,
        out_shape=jax.ShapeDtypeStruct((T, rows, C_out), jnp.float32),
        grid_spec=pltpu.PrefetchScalarGridSpec(
            num_scalar_prefetch=0,
            grid=grid,
            in_specs=[
                pl.BlockSpec((1, tile_rows, C), lambda r, t: (t, r, 0)),
                pl.BlockSpec((C, H),            lambda r, t: (0, 0)),
                pl.BlockSpec((1, H),            lambda r, t: (0, 0)),
                pl.BlockSpec((1, H),            lambda r, t: (0, 0)),
                pl.BlockSpec((H, C_out),        lambda r, t: (0, 0)),
                pl.BlockSpec((1, C_out),        lambda r, t: (0, 0)),
                pl.BlockSpec((1, C_out),        lambda r, t: (0, 0)),
            ],
            out_specs=pl.BlockSpec((1, tile_rows, C_out), lambda r, t: (t, r, 0)),
            scratch_shapes=[
                pltpu.VMEM((tile_rows, H), jnp.float32),      # LIF-1 membrane
                pltpu.VMEM((tile_rows, C_out), jnp.float32),  # LIF-2 membrane
            ],
        ),
        compiler_params=pltpu.CompilerParams(
            dimension_semantics=("parallel", "arbitrary"),
        ),
    )(x2, w1_t, scale1, shift1, w2_t, scale2, shift2)

    return out.reshape(T, B, N, C_out)


def _mlp_reference(x, w1, gamma1, beta1, mean1, var1,
                   w2, gamma2, beta2, mean2, var2,
                   tau=2.0, v_threshold=0.5, eps=1e-5):
    """Pure-JAX reference for correctness checking."""
    T, B, N, C = x.shape
    rows = B * N
    sc1 = gamma1 / jnp.sqrt(var1 + eps)
    sh1 = beta1 - mean1 * sc1
    sc2 = gamma2 / jnp.sqrt(var2 + eps)
    sh2 = beta2 - mean2 * sc2

    def lif(seq):  # seq: (T, rows, F)
        def step(v, xt):
            v = v + (xt - v) / tau
            s = (v >= v_threshold).astype(jnp.float32)
            return v * (1.0 - s), s
        _, spikes = jax.lax.scan(step, jnp.zeros_like(seq[0]), seq)
        return spikes

    xf = x.reshape(T * rows, C).astype(jnp.float32)
    h = jax.lax.dot_general(xf, jnp.asarray(w1, jnp.float32).T,
                            (((1,), (0,)), ((), ())),
                            precision=jax.lax.Precision.HIGHEST)
    h = h * sc1 + sh1
    s1 = lif(h.reshape(T, rows, -1))

    y = jax.lax.dot_general(s1.reshape(T * rows, -1), jnp.asarray(w2, jnp.float32).T,
                            (((1,), (0,)), ((), ())),
                            precision=jax.lax.Precision.HIGHEST)
    y = y * sc2 + sh2
    s2 = lif(y.reshape(T, rows, -1))
    return s2.reshape(T, B, N, -1)


if __name__ == "__main__":
    # Small, lane-friendly shapes implied by forward: x is (T, B, N, C).
    T, B, N = 4, 2, 16
    C, H = 128, 256     # in_features = out_features = C, hidden_features = H

    key = jax.random.PRNGKey(0)
    ks = jax.random.split(key, 11)
    x = jax.random.uniform(ks[0], (T, B, N, C), jnp.float32)

    w1 = jax.random.normal(ks[1], (H, C), jnp.float32) * (1.0 / jnp.sqrt(C))
    w2 = jax.random.normal(ks[2], (C, H), jnp.float32) * (1.0 / jnp.sqrt(H))

    gamma1 = 1.0 + 0.1 * jax.random.normal(ks[3], (H,), jnp.float32)
    beta1 = 0.1 * jax.random.normal(ks[4], (H,), jnp.float32)
    mean1 = 0.05 * jax.random.normal(ks[5], (H,), jnp.float32)
    var1 = 1.0 + 0.1 * jax.random.uniform(ks[6], (H,), jnp.float32)

    gamma2 = 1.0 + 0.1 * jax.random.normal(ks[7], (C,), jnp.float32)
    beta2 = 0.1 * jax.random.normal(ks[8], (C,), jnp.float32)
    mean2 = 0.05 * jax.random.normal(ks[9], (C,), jnp.float32)
    var2 = 1.0 + 0.1 * jax.random.uniform(ks[10], (C,), jnp.float32)

    out = mlp_forward(x, w1, gamma1, beta1, mean1, var1,
                      w2, gamma2, beta2, mean2, var2)
    out = jax.block_until_ready(out)

    # Sanity checks: shape/dtype, binary spikes, agreement with pure-JAX reference.
    assert out.shape == (T, B, N, C), out.shape
    assert out.dtype == jnp.float32, out.dtype
    assert bool(jnp.all((out == 0.0) | (out == 1.0)))

    ref = _mlp_reference(x, w1, gamma1, beta1, mean1, var1,
                         w2, gamma2, beta2, mean2, var2)
    mismatch_frac = float(jnp.mean(jnp.abs(out - ref)))
    # Spikes are hard-threshold decisions; allow a tiny fraction of near-threshold flips.
    assert mismatch_frac < 0.02, mismatch_frac

    print("KERNEL_OK")
</pallas_src>

<mosaic_0001>
module attributes {stable_mosaic.version = 11 : i64} {
  func.func @_mlp_kernel(%arg0: i32, %arg1: i32, %arg2: memref<1x32x128xf32, #tpu.memory_space<vmem>>, %arg3: memref<128x256xf32, #tpu.memory_space<vmem>>, %arg4: memref<1x256xf32, #tpu.memory_space<vmem>>, %arg5: memref<1x256xf32, #tpu.memory_space<vmem>>, %arg6: memref<256x128xf32, #tpu.memory_space<vmem>>, %arg7: memref<1x128xf32, #tpu.memory_space<vmem>>, %arg8: memref<1x128xf32, #tpu.memory_space<vmem>>, %arg9: memref<1x32x128xf32, #tpu.memory_space<vmem>>, %arg10: memref<32x256xf32, #tpu.memory_space<vmem>>, %arg11: memref<32x128xf32, #tpu.memory_space<vmem>>) attributes {dimension_semantics = [#tpu.dimension_semantics<parallel>, #tpu.dimension_semantics<arbitrary>], iteration_bounds = array<i64: 1, 4>, scalar_prefetch = 0 : i64, scratch_operands = 2 : i64, tpu.core_type = #tpu.core_type<tc>, window_params = [{transform_indices = @transform_0, window_bounds = array<i64: 1, 32, 128>}, {pipeline_mode = #tpu.pipeline_mode<synchronous>, transform_indices = @transform_1, window_bounds = array<i64: 128, 256>}, {pipeline_mode = #tpu.pipeline_mode<synchronous>, transform_indices = @transform_2, window_bounds = array<i64: 1, 256>}, {pipeline_mode = #tpu.pipeline_mode<synchronous>, transform_indices = @transform_3, window_bounds = array<i64: 1, 256>}, {pipeline_mode = #tpu.pipeline_mode<synchronous>, transform_indices = @transform_4, window_bounds = array<i64: 256, 128>}, {pipeline_mode = #tpu.pipeline_mode<synchronous>, transform_indices = @transform_5, window_bounds = array<i64: 1, 128>}, {pipeline_mode = #tpu.pipeline_mode<synchronous>, transform_indices = @transform_6, window_bounds = array<i64: 1, 128>}, {transform_indices = @transform_7, window_bounds = array<i64: 1, 32, 128>}]} {
    %c0_i32 = arith.constant 0 : i32
    %0 = arith.cmpi eq, %arg1, %c0_i32 : i32
    %1 = arith.extui %0 : i1 to i32
    %c0_i32_0 = arith.constant 0 : i32
    %2 = arith.cmpi ne, %1, %c0_i32_0 : i32
    scf.if %2 {
      %cst_37 = arith.constant 0.000000e+00 : f32
      %52 = vector.broadcast %cst_37 : f32 to vector<32x256xf32>
      %c0_38 = arith.constant 0 : index
      %c0_39 = arith.constant 0 : index
      %53 = vector.load %arg10[%c0_38, %c0_39] : memref<32x256xf32, #tpu.memory_space<vmem>>, vector<32x256xf32>
      tpu.vector_store %arg10[%c0_38, %c0_39], %52 {strides = array<i32>} : memref<32x256xf32, #tpu.memory_space<vmem>>, vector<32x256xf32>,
      %cst_40 = arith.constant 0.000000e+00 : f32
      %54 = vector.broadcast %cst_40 : f32 to vector<32x128xf32>
      %c0_41 = arith.constant 0 : index
      %c0_42 = arith.constant 0 : index
      %55 = vector.load %arg11[%c0_41, %c0_42] : memref<32x128xf32, #tpu.memory_space<vmem>>, vector<32x128xf32>
      tpu.vector_store %arg11[%c0_41, %c0_42], %54 {strides = array<i32>} : memref<32x128xf32, #tpu.memory_space<vmem>>, vector<32x128xf32>,
    } else {
    }
    %c0 = arith.constant 0 : index
    %c0_1 = arith.constant 0 : index
    %c0_2 = arith.constant 0 : index
    %3 = vector.load %arg2[%c0, %c0_1, %c0_2] : memref<1x32x128xf32, #tpu.memory_space<vmem>>, vector<1x32x128xf32>
    %4 = vector.shape_cast %3 : vector<1x32x128xf32> to vector<32x128xf32>
    %c0_3 = arith.constant 0 : index
    %c0_4 = arith.constant 0 : index
    %5 = vector.load %arg3[%c0_3, %c0_4] : memref<128x256xf32, #tpu.memory_space<vmem>>, vector<128x256xf32>
    %cst = arith.constant dense<0.000000e+00> : vector<32x256xf32>
    %6 = tpu.matmul %4, %5, %cst {dimension_numbers = #tpu.dot_dimension_numbers<[1], [0], [0], [1], [0, 0, 1, 1], [], []>} : vector<32x128xf32>, vector<128x256xf32>, vector<32x256xf32> -> vector<32x256xf32>
    %c0_5 = arith.constant 0 : index
    %c0_6 = arith.constant 0 : index
    %7 = vector.load %arg4[%c0_5, %c0_6] : memref<1x256xf32, #tpu.memory_space<vmem>>, vector<1x256xf32>
    %8 = vector.broadcast %7 : vector<1x256xf32> to vector<32x256xf32>
    %9 = arith.mulf %6, %8 : vector<32x256xf32>
    %c0_7 = arith.constant 0 : index
    %c0_8 = arith.constant 0 : index
    %10 = vector.load %arg5[%c0_7, %c0_8] : memref<1x256xf32, #tpu.memory_space<vmem>>, vector<1x256xf32>
    %11 = vector.broadcast %10 : vector<1x256xf32> to vector<32x256xf32>
    %12 = arith.addf %9, %11 : vector<32x256xf32>
    %c0_9 = arith.constant 0 : index
    %c0_10 = arith.constant 0 : index
    %13 = vector.load %arg10[%c0_9, %c0_10] : memref<32x256xf32, #tpu.memory_space<vmem>>, vector<32x256xf32>
    %c0_11 = arith.constant 0 : index
    %c0_12 = arith.constant 0 : index
    %14 = vector.load %arg10[%c0_11, %c0_12] : memref<32x256xf32, #tpu.memory_space<vmem>>, vector<32x256xf32>
    %15 = arith.subf %12, %14 : vector<32x256xf32>
    %cst_13 = arith.constant 5.000000e-01 : f32
    %16 = vector.broadcast %cst_13 : f32 to vector<32x256xf32>
    %17 = arith.mulf %15, %16 : vector<32x256xf32>
    %18 = arith.addf %13, %17 : vector<32x256xf32>
    %cst_14 = arith.constant 5.000000e-01 : f32
    %19 = vector.broadcast %cst_14 : f32 to vector<32x256xf32>
    %20 = arith.cmpf oge, %18, %19 : vector<32x256xf32>
    %21 = arith.extui %20 : vector<32x256xi1> to vector<32x256xi32>
    %22 = arith.sitofp %21 : vector<32x256xi32> to vector<32x256xf32>
    %cst_15 = arith.constant 1.000000e+00 : f32
    %23 = vector.broadcast %cst_15 : f32 to vector<32x256xf32>
    %24 = arith.subf %23, %22 : vector<32x256xf32>
    %25 = arith.mulf %18, %24 : vector<32x256xf32>
    %c0_16 = arith.constant 0 : index
    %c0_17 = arith.constant 0 : index
    %26 = vector.load %arg10[%c0_16, %c0_17] : memref<32x256xf32, #tpu.memory_space<vmem>>, vector<32x256xf32>
    tpu.vector_store %arg10[%c0_16, %c0_17], %25 {strides = array<i32>} : memref<32x256xf32, #tpu.memory_space<vmem>>, vector<32x256xf32>,
    %c0_18 = arith.constant 0 : index
    %c0_19 = arith.constant 0 : index
    %27 = vector.load %arg6[%c0_18, %c0_19] : memref<256x128xf32, #tpu.memory_space<vmem>>, vector<256x128xf32>
    %cst_20 = arith.constant dense<0.000000e+00> : vector<32x128xf32>
    %28 = tpu.matmul %22, %27, %cst_20 {dimension_numbers = #tpu.dot_dimension_numbers<[1], [0], [0], [1], [0, 0, 1, 1], [], []>} : vector<32x256xf32>, vector<256x128xf32>, vector<32x128xf32> -> vector<32x128xf32>
    %c0_21 = arith.constant 0 : index
    %c0_22 = arith.constant 0 : index
    %29 = vector.load %arg7[%c0_21, %c0_22] : memref<1x128xf32, #tpu.memory_space<vmem>>, vector<1x128xf32>
    %30 = vector.broadcast %29 : vector<1x128xf32> to vector<32x128xf32>
    %31 = arith.mulf %28, %30 : vector<32x128xf32>
    %c0_23 = arith.constant 0 : index
    %c0_24 = arith.constant 0 : index
    %32 = vector.load %arg8[%c0_23, %c0_24] : memref<1x128xf32, #tpu.memory_space<vmem>>, vector<1x128xf32>
    %33 = vector.broadcast %32 : vector<1x128xf32> to vector<32x128xf32>
    %34 = arith.addf %31, %33 : vector<32x128xf32>
    %c0_25 = arith.constant 0 : index
    %c0_26 = arith.constant 0 : index
    %35 = vector.load %arg11[%c0_25, %c0_26] : memref<32x128xf32, #tpu.memory_space<vmem>>, vector<32x128xf32>
    %c0_27 = arith.constant 0 : index
    %c0_28 = arith.constant 0 : index
    %36 = vector.load %arg11[%c0_27, %c0_28] : memref<32x128xf32, #tpu.memory_space<vmem>>, vector<32x128xf32>
    %37 = arith.subf %34, %36 : vector<32x128xf32>
    %cst_29 = arith.constant 5.000000e-01 : f32
    %38 = vector.broadcast %cst_29 : f32 to vector<32x128xf32>
    %39 = arith.mulf %37, %38 : vector<32x128xf32>
    %40 = arith.addf %35, %39 : vector<32x128xf32>
    %cst_30 = arith.constant 5.000000e-01 : f32
    %41 = vector.broadcast %cst_30 : f32 to vector<32x128xf32>
    %42 = arith.cmpf oge, %40, %41 : vector<32x128xf32>
    %43 = arith.extui %42 : vector<32x128xi1> to vector<32x128xi32>
    %44 = arith.sitofp %43 : vector<32x128xi32> to vector<32x128xf32>
    %cst_31 = arith.constant 1.000000e+00 : f32
    %45 = vector.broadcast %cst_31 : f32 to vector<32x128xf32>
    %46 = arith.subf %45, %44 : vector<32x128xf32>
    %47 = arith.mulf %40, %46 : vector<32x128xf32>
    %c0_32 = arith.constant 0 : index
    %c0_33 = arith.constant 0 : index
    %48 = vector.load %arg11[%c0_32, %c0_33] : memref<32x128xf32, #tpu.memory_space<vmem>>, vector<32x128xf32>
    tpu.vector_store %arg11[%c0_32, %c0_33], %47 {strides = array<i32>} : memref<32x128xf32, #tpu.memory_space<vmem>>, vector<32x128xf32>,
    %c0_34 = arith.constant 0 : index
    %c0_35 = arith.constant 0 : index
    %c0_36 = arith.constant 0 : index
    %49 = vector.load %arg9[%c0_34, %c0_35, %c0_36] : memref<1x32x128xf32, #tpu.memory_space<vmem>>, vector<1x32x128xf32>
    %50 = vector.shape_cast %49 : vector<1x32x128xf32> to vector<32x128xf32>
    %51 = vector.shape_cast %44 : vector<32x128xf32> to vector<1x32x128xf32>
    tpu.vector_store %arg9[%c0_34, %c0_35, %c0_36], %51 {strides = array<i32>} : memref<1x32x128xf32, #tpu.memory_space<vmem>>, vector<1x32x128xf32>,
    return
  }
  func.func @transform_0(%arg0: i32, %arg1: i32) -> (i32, i32, i32) {
    %c0_i32 = arith.constant 0 : i32
    %c0_i32_0 = arith.constant 0 : i32
    return %arg1, %arg0, %c0_i32 : i32, i32, i32
  }
  func.func @transform_1(%arg0: i32, %arg1: i32) -> (i32, i32) {
    %c0_i32 = arith.constant 0 : i32
    %c0_i32_0 = arith.constant 0 : i32
    %c0_i32_1 = arith.constant 0 : i32
    return %c0_i32, %c0_i32_0 : i32, i32
  }
  func.func @transform_2(%arg0: i32, %arg1: i32) -> (i32, i32) {
    %c0_i32 = arith.constant 0 : i32
    %c0_i32_0 = arith.constant 0 : i32
    %c0_i32_1 = arith.constant 0 : i32
    return %c0_i32, %c0_i32_0 : i32, i32
  }
  func.func @transform_3(%arg0: i32, %arg1: i32) -> (i32, i32) {
    %c0_i32 = arith.constant 0 : i32
    %c0_i32_0 = arith.constant 0 : i32
    %c0_i32_1 = arith.constant 0 : i32
    return %c0_i32, %c0_i32_0 : i32, i32
  }
  func.func @transform_4(%arg0: i32, %arg1: i32) -> (i32, i32) {
    %c0_i32 = arith.constant 0 : i32
    %c0_i32_0 = arith.constant 0 : i32
    %c0_i32_1 = arith.constant 0 : i32
    return %c0_i32, %c0_i32_0 : i32, i32
  }
  func.func @transform_5(%arg0: i32, %arg1: i32) -> (i32, i32) {
    %c0_i32 = arith.constant 0 : i32
    %c0_i32_0 = arith.constant 0 : i32
    %c0_i32_1 = arith.constant 0 : i32
    return %c0_i32, %c0_i32_0 : i32, i32
  }
  func.func @transform_6(%arg0: i32, %arg1: i32) -> (i32, i32) {
    %c0_i32 = arith.constant 0 : i32
    %c0_i32_0 = arith.constant 0 : i32
    %c0_i32_1 = arith.constant 0 : i32
    return %c0_i32, %c0_i32_0 : i32, i32
  }
  func.func @transform_7(%arg0: i32, %arg1: i32) -> (i32, i32, i32) {
    %c0_i32 = arith.constant 0 : i32
    %c0_i32_0 = arith.constant 0 : i32
    return %arg1, %arg0, %c0_i32 : i32, i32, i32
  }
}

</mosaic_0001>

<bundles_post_ra>
// kernel: tpu_custom_call.1
= control target key start
LH: loop header
LB: loop body
LE: loop exit
PB: predicated region body
PF: predicated region fallthrough
CT: control target
= control target key end

     0   :  { %s1523_s0 = inlined_call_operand.hbm [shape: f32[4,32,128], index: 0, kind: input, shape index: {}]   ;;  %s1524_s1 = inlined_call_operand.hbm [shape: f32[128,256], index: 1, kind: input, shape index: {}]   ;;  %s1525_s2 = inlined_call_operand.hbm [shape: f32[1,256], index: 2, kind: input, shape index: {}]   ;;  %s1526_s3 = inlined_call_operand.vmem [shape: f32[1,256], index: 3, kind: input, shape index: {}]   ;;  %s1527_s4 = inlined_call_operand.hbm [shape: f32[256,128], index: 4, kind: input, shape index: {}]   ;;  %s1528_s5 = inlined_call_operand.vmem [shape: f32[1,128], index: 5, kind: input, shape index: {}]   ;;  %s1529_s6 = inlined_call_operand.vmem [shape: f32[1,128], index: 6, kind: input, shape index: {}]   ;;  %s1530_s7 = inlined_call_operand.hbm [shape: f32[4,32,128], index: 7, kind: output, shape index: {}]  }
   0x1   :  { %1535 = sst [smem:[#allocation19_spill]] %s1524_s1 }
   0x2   :  { %1536 = sst [smem:[#allocation20_spill]] %s1525_s2 }
   0x3   :  { %1537 = sst [smem:[#allocation21_spill]] %s1527_s4 }
   0x4   :  { %12 = vsyncpa [#allocation5], 0 }
   0x5   :  { %14 = vsyncpa [#allocation5 + $0x1], 0 }
   0x6   :  { %15 = vsyncpa [#allocation8], 0 }
   0x7   :  { %16 = vsyncpa [#allocation11], 0 }
   0x8   :  { %17 = vsyncpa [#allocation6], 0 }
   0x9   :  { %19 = vsyncpa [#allocation6 + $0x1], 0  ;;  %s1281_s24 = smov 0   ;;  %s1283_s25 = smov 0  }
   0xa   :  { %s1285_s26 = smov 0   ;;  %s1287_s27 = smov 0  }
   0xb   :  { %s1289_s28 = smov 0   ;;  %s1291_s29 = smov 0  }
   0xc LB: > { %s869_s30 = sadd.s32 4294967295, %s1227_s29   ;;  %s870_s8 = sadd.s32 4294967294, %s1227_s29   ;;  %s1227_s29 = sphi %s1291_s29, %s25_s29   ;;  %s1223_s28 = sphi %s1289_s28, %s1559_s28   ;;  %s1219_s27 = sphi %s1287_s27, %s1558_s27   ;;  %s1215_s26 = sphi %s1285_s26, %s1557_s26   ;;  %s1211_s25 = sphi %s1283_s25, %s1556_s25   ;;  %s1207_s24 = sphi %s1281_s24, %s1555_s24  }
   0xd   : > { %p59_p0 = scmp.ne.s32.totalorder %s1211_s25, %s1207_s24  ;;  %p1315_p1 = scmp.eq.s32.totalorder %s869_s30, 0 }
   0xe   : > { %p1319_p2 = scmp.eq.s32.totalorder %s869_s30, 3  ;;  %p217_p3 = scmp.eq.s32.totalorder %s870_s8, 3 }
   0xf   : > { %p1325_p4 = por %p1315_p1, %p59_p0  ;;  %p871_p5 = scmp.ge.s32.totalorder %s1227_s29, 1 }
  0x10   : > { %p1330_p6 = por %p217_p3, %p59_p0  ;;  %p224_p7 = scmp.lt.s32.totalorder %s1227_s29, 5 }
  0x11   : > { %s1543_s1 = sld [smem:[#allocation19_spill]]  ;;  %s1229_s17 = smov [#allocation7]  }
  0x12   : > { %s1541_s12 = scalar_select %p1330_p6, 1, 0 }
  0x13   : > { %p1338_p8 = pnand %p871_p5, %p224_p7  ;;  %s237_s18 = sshll.u32 %s1229_s17, 4  ;;  %s238_s18 = int_to_ptr.vmem [resolvable:$true] %s237_s18 }
  0x14   : > { %1542 = sst [smem:[#allocation17_spill]] %s1541_s12  ;;  %s1230_s23 = smov 256  }
  0x15   : > { %p929_p9 = pneg %p1338_p8  ;;  %s1546_s2 = sld [smem:[#allocation20_spill]] }
  0x16   : > { %s1231_s30 = smov 16   ;;  %s1232_s8 = smov [#allocation9]  }
  0x17   : > { %s235_s15 = sshll.u32 %s1543_s1, 4  ;;  %p1346_p10 = pnand %p929_p9, %p1315_p1  ;;  %s236_s15 = int_to_ptr.hbm [resolvable:$true] %s235_s15 }
  0x18   : > { %s252_s13 = sshll.u32 %s1232_s8, 4  ;;  %s1547_s4 = sld [smem:[#allocation21_spill]]  ;;  %s253_s13 = int_to_ptr.vmem [resolvable:$true] %s252_s13 }
  0x19   : > { %932 = dma.hbm_to_vmem [thread:$0]  (!%p1346_p10), %s236_s15, 4096, %s238_s18, [#allocation8], %s1230_s23, %s1230_s23, %s1231_s30  }
  0x1a   : > { %s1233_s21 = smov [#allocation10]   ;;  %s1532_s15 = smov 8  }
  0x1b   : > { %s250_s22 = sshll.u32 %s1546_s2, 4  ;;  %s266_s1 = sshll.u32 %s1233_s21, 4  ;;  %s251_s22 = int_to_ptr.hbm [resolvable:$true] %s250_s22  ;;  %s267_s1 = int_to_ptr.vmem [resolvable:$true] %s266_s1 }
  0x1c   : > { %935 = dma.hbm_to_vmem [thread:$0]  (!%p1346_p10), %s251_s22, 32, %s253_s13, [#allocation8]  }
  0x1d   : > { %s1531_s2 = smov 128   ;;  %s46_s18 = sadd.s32 1, %s1215_s26 }
  0x1e   : > { %s264_s20 = sshll.u32 %s1547_s4, 4  ;;  %s34_s23 = sadd.s32 1, %s1223_s28  ;;  %s265_s20 = int_to_ptr.hbm [resolvable:$true] %s264_s20 }
  0x1f   : > { %938 = dma.hbm_to_vmem [thread:$0]  (!%p1346_p10), %s265_s20, 4096, %s267_s1, [#allocation11], %s1531_s2, %s1531_s2, %s1532_s15  }
  0x20   : > { %p53_p11 = scmp.ne.s32.totalorder %s1215_s26, %s1211_s25  ;;  %p35_p12 = scmp.ge.s32.totalorder %s34_s23, 4 }
  0x21   : > { %p54_p13 = scmp.eq.s32.totalorder %s1227_s29, 0  ;;  %p950_p3 = scmp.lt.s32.totalorder %s1227_s29, 4 }
  0x22   : > { %p1372_p0 = por %p1319_p2, %p53_p11  ;;  %s1561_s23 = smov (%p35_p12, %s34_s23), 0 }
  0x23   : > { %1549 = sst [smem:[#allocation18_spill]] %s1561_s23  ;;  %p1379_p5 = por %p54_p13, %p53_p11 }
  0x24   : > { %s286_s1 = sand.u32 1, %s1215_s26   ;;  %s41_s30 = ssub.s32 %s1223_s28, %s1561_s23 }
  0x25   : > { %p44_p7 = scmp.eq.s32.totalorder %s41_s30, 0  ;;  %s876_s8 = sshll.u32 %s286_s1, 5 }
  0x26   : > { %s911_s13 = sshll.u32 %s1223_s28, 5  ;;  %s290_s21 = scalar_lea.vmem [#allocation4], %s876_s8 }
  0x27   : > { %s1388_s10 = scalar_select %p44_p7, %s1215_s26, %s46_s18  }
  0x28   : > { %s297_s20 = scalar_lea.hbm %s1523_s0, %s911_s13  ;;  %s300_s2 = sshll.u32 %s290_s21, 4  ;;  %s301_s2 = int_to_ptr.vmem [resolvable:$true] %s300_s2 }
  0x29   : > { %s298_s15 = sshll.u32 %s297_s20, 4  ;;  %p940_p2 = pnand %p950_p3, %p1379_p5  ;;  %s299_s15 = int_to_ptr.hbm [resolvable:$true] %s298_s15 }
  0x2a   : > { %s287_s4 = scalar_lea.sflag [#allocation5], %s286_s1  ;;  %s1551_s12 = smov 8  }
  0x2b   : > { %s1552_s23 = smov 128   ;;  %312 = sbr.rel (%p1338_p8) target bundleno = 417 (0x1a1), region = 48 }
  0x2c   : > { %942 = dma.hbm_to_vmem [thread:$0]  (!%p940_p2), %s299_s15, 512, %s301_s2, %s287_s4, %s1552_s23, %s1552_s23, %s1551_s12  }
  0x2d   : > { %s1403_s18 = sand.u32 (!%p1338_p8), 1, %s1211_s25  }
  0x2e   : > { %s880_s30 = sshll.u32 (!%p1338_p8), %s1403_s18, 5  ;;  %s315_s8 = scalar_lea.sflag (!%p1338_p8), [#allocation5], %s1403_s18 }
  0x2f   : > { %s1407_s13 = scalar_lea.vmem (!%p1338_p8), [#allocation4], %s880_s30 }
  0x30   : > { %1190 = dma.done.wait (%p1325_p4), %s315_s8, 512  }
  0x31   : > { %1192 = vsyncadd (%p1325_p4), %s315_s8, 4294966784 }
  0x32   : > { %1194 = dma.done.wait (%p1315_p1), [#allocation8], 4128  }
  0x33   : > { %1196 = vsyncadd (%p1315_p1), [#allocation8], 4294963168 }
  0x34   : > { %1198 = dma.done.wait (%p1315_p1), [#allocation11], 4096  }
  0x35   : > { %1200 = vsyncadd (%p1315_p1), [#allocation11], 4294963200  ;;  %s1421_s2 = scalar_lea.vmem [#allocation12], %s880_s30  ;;  %p885_p8 = scmp.ne.s32.totalorder %s1219_s27, 0 }
  0x37   : > { %370 = sbr.rel (%p885_p8) target bundleno = 73 (0x49), region = 68 }
  0x3c   : > { %v1236_v0 = vmov 0.0  }
  0x3d   : > { %371 = vst [vmem:[#allocation2 + $0x30] sm:$0xff] %v1236_v0 }
  0x3e   : > { %372 = vst [vmem:[#allocation2] sm:$0xff] %v1236_v0 }
  0x3f   : > { %373 = vst [vmem:[#allocation2 + $0x18] sm:$0xff] %v1236_v0 }
  0x40   : > { %374 = vst [vmem:[#allocation2 + $0x10] sm:$0xff] %v1236_v0 }
  0x41   : > { %375 = vst [vmem:[#allocation2 + $0x8] sm:$0xff] %v1236_v0 }
  0x42   : > { %376 = vst [vmem:[#allocation2 + $0x20] sm:$0xff] %v1236_v0 }
  0x43   : > { %377 = vst [vmem:[#allocation2 + $0x28] sm:$0xff] %v1236_v0 }
  0x44   : > { %378 = vst [vmem:[#allocation2 + $0x38] sm:$0xff] %v1236_v0 }
  0x45   : > { %379 = vst [vmem:[#allocation3] sm:$0xff] %v1236_v0 }
  0x46   : > { %380 = vst [vmem:[#allocation3 + $0x18] sm:$0xff] %v1236_v0 }
  0x47   : > { %381 = vst [vmem:[#allocation3 + $0x10] sm:$0xff] %v1236_v0 }
  0x48   : > { %382 = vst [vmem:[#allocation3 + $0x8] sm:$0xff] %v1236_v0 }
  0x49 PF: > { %v417_v1 = vld [vmem:[#allocation7 + $0xf0] sm:$0xff]  ;;  %v418_v2 = vld [vmem:[#allocation7 + $0xf8] sm:$0xff]  ;;  %v415_v3 = vld [vmem:[#allocation7 + $0xe0] sm:$0xff]  ;;  %s912_s23 = sshll.u32 %s1219_s27, 5  ;;  %s750_s17 = sshll.u32 %s1421_s2, 4  ;;  %s751_s17 = int_to_ptr.vmem [resolvable:$true] %s750_s17 }
  0x4a   : > { %419 = vmatpush.msra.mxu0 %v417_v1  ;;  %448 = vmatpush.msra.mxu1 %v418_v2  ;;  %v416_v4 = vld [vmem:[#allocation7 + $0xe8] sm:$0xff]  ;;  %v413_v5 = vld [vmem:[#allocation7 + $0xd0] sm:$0xff]  ;;  %v414_v6 = vld [vmem:[#allocation7 + $0xd8] sm:$0xff]  ;;  %s749_s14 = scalar_lea.hbm %s1530_s7, %s912_s23  ;;  %s736_s27 = scalar_lea.sflag [#allocation6], %s1403_s18 }
  0x4b   : > { %v411_v7 = vld [vmem:[#allocation7 + $0xc0] sm:$0xff]  ;;  %v412_v8 = vld [vmem:[#allocation7 + $0xc8] sm:$0xff]  ;;  %v409_v9 = vld [vmem:[#allocation7 + $0xb0] sm:$0xff]  ;;  %s752_s20 = sshll.u32 %s749_s14, 4  ;;  %s1157_s4 = scalar_lea.hbm %s1530_s7, 128  ;;  %s753_s20 = int_to_ptr.hbm [resolvable:$true] %s752_s20 }
  0x4c   : > { %420 = vmatpush.msra.mxu0 %v415_v3  ;;  %449 = vmatpush.msra.mxu1 %v416_v4  ;;  %v410_v10 = vld [vmem:[#allocation7 + $0xb8] sm:$0xff]  ;;  %v407_v11 = vld [vmem:[#allocation7 + $0xa0] sm:$0xff]  ;;  %v408_v12 = vld [vmem:[#allocation7 + $0xa8] sm:$0xff]  ;;  %s1151_s21 = sshra.s32 %s753_s20, 4  ;;  %s1152_s21 = int_to_ptr.hbm [resolvable:$true] %s1151_s21 }
  0x4d   : > { %v405_v13 = vld [vmem:[#allocation7 + $0x90] sm:$0xff]  ;;  %v406_v14 = vld [vmem:[#allocation7 + $0x98] sm:$0xff]  ;;  %v403_v15 = vld [vmem:[#allocation7 + $0x80] sm:$0xff]  ;;  %s1153_s30 = scalar_lea.hbm %s1152_s21, 32  ;;  %p1158_p10 = scmp.lt.s32.totalorder %s1152_s21, %s1530_s7 }
  0x4e   : > { %421 = vmatpush.msra.mxu0 %v413_v5  ;;  %450 = vmatpush.msra.mxu1 %v414_v6  ;;  %v404_v16 = vld [vmem:[#allocation7 + $0x88] sm:$0xff]  ;;  %v401_v17 = vld [vmem:[#allocation7 + $0x70] sm:$0xff]  ;;  %v402_v18 = vld [vmem:[#allocation7 + $0x78] sm:$0xff]  ;;  %p1154_p1 = scmp.ne.s32.totalorder %s1152_s21, %s1153_s30  ;;  %p1159_p11 = scmp.lt.s32.totalorder %s1157_s4, %s1153_s30 }
  0x4f   : > { %v399_v19 = vld [vmem:[#allocation7 + $0x60] sm:$0xff]  ;;  %v400_v20 = vld [vmem:[#allocation7 + $0x68] sm:$0xff]  ;;  %v397_v21 = vld [vmem:[#allocation7 + $0x50] sm:$0xff] }
  0x50   : > { %422 = vmatpush.msra.mxu0 %v411_v7  ;;  %451 = vmatpush.msra.mxu1 %v412_v8  ;;  %v398_v22 = vld [vmem:[#allocation7 + $0x58] sm:$0xff]  ;;  %v395_v23 = vld [vmem:[#allocation7 + $0x40] sm:$0xff]  ;;  %v396_v24 = vld [vmem:[#allocation7 + $0x48] sm:$0xff]  ;;  %p1155_p4 = pnand %p1154_p1, %p1372_p0  ;;  %p1160_p12 = por %p1159_p11, %p1158_p10 }
  0x51   : > { %v393_v25 = vld [vmem:[#allocation7 + $0x30] sm:$0xff]  ;;  %v394_v26 = vld [vmem:[#allocation7 + $0x38] sm:$0xff]  ;;  %v391_v27 = vld [vmem:[#allocation7 + $0x20] sm:$0xff] }
  0x52   : > { %423 = vmatpush.msra.mxu0 %v409_v9  ;;  %452 = vmatpush.msra.mxu1 %v410_v10  ;;  %v392_v28 = vld [vmem:[#allocation7 + $0x28] sm:$0xff]  ;;  %v600_v29 = vld [vmem:[#allocation10 + $0x78] sm:$0xff]  ;;  %v599_v31 = vld [vmem:[#allocation10 + $0x70] sm:$0xff]  ;;  %p1156_p9 = pneg %p1155_p4 }
  0x53   : > { %v616_v30 = vld [vmem:[#allocation10 + $0xf8] sm:$0xff]  ;;  %v615_v32 = vld [vmem:[#allocation10 + $0xf0] sm:$0xff]  ;;  %617 = vmatpush.msra.mxu2 %v600_v29  ;;  %v598_v35 = vld [vmem:[#allocation10 + $0x68] sm:$0xff] }
  0x54   : > { %424 = vmatpush.msra.mxu0 %v407_v11  ;;  %453 = vmatpush.msra.mxu1 %v408_v12  ;;  %v389_v33 = vld [vmem:[#allocation7 + $0x10] sm:$0xff]  ;;  %v390_v34 = vld [vmem:[#allocation7 + $0x18] sm:$0xff]  ;;  %v387_v37 = vld [vmem:[#allocation7] sm:$0xff]  ;;  %p1161_p13 = pnand %p1160_p12, %p1156_p9 }
  0x55   : > { %646 = vmatpush.msra.mxu3 %v616_v30  ;;  %v614_v36 = vld [vmem:[#allocation10 + $0xe8] sm:$0xff]  ;;  %618 = vmatpush.msra.mxu2 %v599_v31  ;;  %v383_v39 = vld [vmem:[%s1407_s13] sm:$0xff]  ;;  %v595_v44 = vld [vmem:[#allocation10 + $0x50] sm:$0xff] }
  0x56   : > { %425 = vmatpush.msra.mxu0 %v405_v13  ;;  %454 = vmatpush.msra.mxu1 %v406_v14  ;;  %v388_v38 = vld [vmem:[#allocation7 + $0x8] sm:$0xff]  ;;  %v596_v42 = vld [vmem:[#allocation10 + $0x58] sm:$0xff]  ;;  %v611_v45 = vld [vmem:[#allocation10 + $0xd0] sm:$0xff] }
  0x57   : > { %647 = vmatpush.msra.mxu3 %v615_v32  ;;  %619 = vmatpush.msra.mxu2 %v598_v35  ;;  %v597_v40 = vld [vmem:[#allocation10 + $0x60] sm:$0xff]  ;;  %v612_v43 = vld [vmem:[#allocation10 + $0xd8] sm:$0xff]  ;;  %v594_v46 = vld [vmem:[#allocation10 + $0x48] sm:$0xff]  ;;  %v1238_v35 = vmov 1.0  }
  0x58   : > { %426 = vmatpush.msra.mxu0 %v403_v15  ;;  %455 = vmatpush.msra.mxu1 %v404_v16  ;;  %v613_v41 = vld [vmem:[#allocation10 + $0xe0] sm:$0xff]  ;;  %v610_v47 = vld [vmem:[#allocation10 + $0xc8] sm:$0xff]  ;;  %v592_v51 = vld [vmem:[#allocation10 + $0x38] sm:$0xff] }
  0x59   : > { %648 = vmatpush.msra.mxu3 %v614_v36  ;;  %620 = vmatpush.msra.mxu2 %v597_v40  ;;  %v384_v48 = vld [vmem:[%s1407_s13 + $0x8] sm:$0xff]  ;;  %v608_v52 = vld [vmem:[#allocation10 + $0xb8] sm:$0xff]  ;;  %v591_v53 = vld [vmem:[#allocation10 + $0x30] sm:$0xff] }
  0x5a   : > { %427 = vmatpush.msra.mxu0 %v401_v17  ;;  %456 = vmatpush.msra.mxu1 %v402_v18  ;;  %v593_v49 = vld [vmem:[#allocation10 + $0x40] sm:$0xff]  ;;  %v607_v54 = vld [vmem:[#allocation10 + $0xb0] sm:$0xff]  ;;  %v590_v57 = vld [vmem:[#allocation10 + $0x28] sm:$0xff] }
  0x5b   : > { %649 = vmatpush.msra.mxu3 %v613_v41  ;;  %621 = vmatpush.msra.mxu2 %v596_v42  ;;  %v609_v50 = vld [vmem:[#allocation10 + $0xc0] sm:$0xff]  ;;  %v385_v55 = vld [vmem:[%s1407_s13 + $0x10] sm:$0xff]  ;;  %v386_v56 = vld [vmem:[%s1407_s13 + $0x18] sm:$0xff] }
  0x5c   : > { %428 = vmatpush.msra.mxu0 %v399_v19  ;;  %457 = vmatpush.msra.mxu1 %v400_v20  ;;  %v606_v58 = vld [vmem:[#allocation10 + $0xa8] sm:$0xff]  ;;  %v589_v59 = vld [vmem:[#allocation10 + $0x20] sm:$0xff]  ;;  %v588_v61 = vld [vmem:[#allocation10 + $0x18] sm:$0xff] }
  0x5d   : > { %650 = vmatpush.msra.mxu3 %v612_v43  ;;  %622 = vmatpush.msra.mxu2 %v595_v44  ;;  %v605_v60 = vld [vmem:[#allocation10 + $0xa0] sm:$0xff]  ;;  %v604_v62 = vld [vmem:[#allocation10 + $0x98] sm:$0xff]  ;;  %v587_v63 = vld [vmem:[#allocation10 + $0x10] sm:$0xff] }
  0x5e   : > { %429 = vmatpush.msra.mxu0 %v397_v21  ;;  %458 = vmatpush.msra.mxu1 %v398_v22  ;;  %v603_v0 = vld [vmem:[#allocation10 + $0x90] sm:$0xff]  ;;  %v586_v1 = vld [vmem:[#allocation10 + $0x8] sm:$0xff]  ;;  %v585_v3 = vld [vmem:[#allocation10] sm:$0xff] }
  0x5f   : > { %651 = vmatpush.msra.mxu3 %v611_v45  ;;  %623 = vmatpush.msra.mxu2 %v594_v46  ;;  %v602_v2 = vld [vmem:[#allocation10 + $0x88] sm:$0xff]  ;;  %v601_v4 = vld [vmem:[#allocation10 + $0x80] sm:$0xff]  ;;  %v477_v5 = vld [vmem:[#allocation9] sm:$0x3] }
  0x60   : > { %430 = vmatpush.msra.mxu0 %v395_v23  ;;  %459 = vmatpush.msra.mxu1 %v396_v24  ;;  %v491_v6 = vld [vmem:[%s1526_s3] sm:$0x3]  ;;  %v1431_v7 = vperm.slane %v477_v5, 0  ;;  %v1433_v8 = vperm.slane %v477_v5, 1  ;;  %v505_v15 = vld [vmem:[#allocation2 + $0x30] sm:$0xff]  ;;  %v507_v29 = vld [vmem:[#allocation2 + $0x18] sm:$0xff] }
  0x61   : > { %652 = vmatpush.msra.mxu3 %v610_v47  ;;  %624 = vmatpush.msra.mxu2 %v593_v49  ;;  %v1435_v9 = vperm.slane %v491_v6, 0  ;;  %v1437_v10 = vperm.slane %v491_v6, 1  ;;  %v506_v16 = vld [vmem:[#allocation2] sm:$0xff]  ;;  %v508_v30 = vld [vmem:[#allocation2 + $0x10] sm:$0xff] }
  0x62   : > { %431 = vmatpush.msra.mxu0 %v393_v25  ;;  %460 = vmatpush.msra.mxu1 %v394_v26 }
  0x63   : > { %653 = vmatpush.msra.mxu3 %v609_v50  ;;  %625 = vmatpush.msra.mxu2 %v592_v51  ;;  %v509_v51 = vld [vmem:[#allocation2 + $0x8] sm:$0xff] }
  0x64   : > { %432 = vmatpush.msra.mxu0 %v391_v27  ;;  %461 = vmatpush.msra.mxu1 %v392_v28 }
  0x65   : > { %654 = vmatpush.msra.mxu3 %v608_v52  ;;  %626 = vmatpush.msra.mxu2 %v591_v53  ;;  %v510_v52 = vld [vmem:[#allocation2 + $0x20] sm:$0xff] }
  0x66   : > { %433 = vmatpush.msra.mxu0 %v389_v33  ;;  %462 = vmatpush.msra.mxu1 %v390_v34  ;;  %v1237_v33 = vmov 0.0  }
  0x67   : > { %655 = vmatpush.msra.mxu3 %v607_v54  ;;  %627 = vmatpush.msra.mxu2 %v590_v57 }
  0x68   : > { %434 = vmatpush.msra.mxu0 %v387_v37  ;;  %463 = vmatpush.msra.mxu1 %v388_v38 }
  0x69   : > { %435 = vmatmul.f32.vlgmr.msra.gmra.mxu0 %v383_v39  ;;  %464 = vmatmul.f32.vlgmr.msra.gmra.mxu1 %v383_v39 }
  0x6a   : > { %656 = vmatpush.msra.mxu3 %v606_v58  ;;  %628 = vmatpush.msra.mxu2 %v589_v59 }
  0x6c   : > { %657 = vmatpush.msra.mxu3 %v605_v60  ;;  %629 = vmatpush.msra.mxu2 %v588_v61 }
  0x6e   : > { %658 = vmatpush.msra.mxu3 %v604_v62  ;;  %630 = vmatpush.msra.mxu2 %v587_v63 }
  0x70   : > { %659 = vmatpush.msra.mxu3 %v603_v0  ;;  %631 = vmatpush.msra.mxu2 %v586_v1 }
  0x71   : > { %438 = vmatmul.f32.gmra.mxu0 %v384_v48  ;;  %467 = vmatmul.f32.gmra.mxu1 %v384_v48 }
  0x72   : > { %660 = vmatpush.msra.mxu3 %v602_v2  ;;  %632 = vmatpush.msra.mxu2 %v585_v3 }
  0x74   : > { %661 = vmatpush.msra.mxu3 %v601_v4 }
  0x79   : > { %441 = vmatmul.f32.gmra.mxu0 %v385_v55  ;;  %470 = vmatmul.f32.gmra.mxu1 %v385_v55 }
  0x81   : > { %444 = vmatmul.f32.gmra.mxu0 %v386_v56  ;;  %473 = vmatmul.f32.gmra.mxu1 %v386_v56 }
  0xe6   : > { %v436_v11 = vpop.f32.mrf.mxu0  ;;  %v465_v12 = vpop.f32.mrf.mxu1 }
  0xe7   : > { %v483_v13 = vmul.f32 %v1431_v7, %v436_v11  ;;  %v484_v14 = vmul.f32 %v1433_v8, %v465_v12  ;;  %v511_v11 = vld [vmem:[#allocation2 + $0x28] sm:$0xff]  ;;  %v512_v12 = vld [vmem:[#allocation2 + $0x38] sm:$0xff] }
  0xe9   : > { %v497_v17 = vadd.f32 %v1435_v9, %v483_v13  ;;  %v498_v18 = vadd.f32 %v1437_v10, %v484_v14 }
  0xeb   : > { %v513_v19 = vsub.f32 %v497_v17, %v505_v15  ;;  %v514_v20 = vsub.f32 %v498_v18, %v506_v16 }
  0xed   : > { %v521_v21 = vmul.f32 0.5, %v513_v19  ;;  %v522_v22 = vmul.f32 0.5, %v514_v20 }
  0xee   : > { %v439_v23 = vpop.f32.mrf.mxu0  ;;  %v468_v24 = vpop.f32.mrf.mxu1 }
  0xef   : > { %v485_v25 = vmul.f32 %v1431_v7, %v439_v23  ;;  %v486_v26 = vmul.f32 %v1433_v8, %v468_v24  ;;  %v529_v27 = vadd.f32 %v521_v21, %v505_v15  ;;  %v530_v28 = vadd.f32 %v522_v22, %v506_v16 }
  0xf1   : > { %v499_v31 = vadd.f32 %v1435_v9, %v485_v25  ;;  %v500_v32 = vadd.f32 %v1437_v10, %v486_v26  ;;  %vm537_vm0 = vcmp.ge.f32.partialorder %v529_v27, 0.5  ;;  %vm538_vm1 = vcmp.ge.f32.partialorder %v530_v28, 0.5 }
  0xf2   : > { %v886_v34 = vsel %vm537_vm0, 1.0, %v1237_v33  ;;  %894 = vmatmul.msk.f32.vlgmr.msra.gmra.mxu2 %vm537_vm0, %v1238_v35  ;;  %v887_v36 = vsel %vm538_vm1, 1.0, %v1237_v33  ;;  %898 = vmatmul.msk.f32.vlgmr.msra.gmra.mxu3 %vm538_vm1, %v1238_v35 }
  0xf3   : > { %v515_v37 = vsub.f32 %v499_v31, %v507_v29  ;;  %v516_v38 = vsub.f32 %v500_v32, %v508_v30  ;;  %v561_v39 = vsub.f32 1.0, %v886_v34  ;;  %v562_v40 = vsub.f32 1.0, %v887_v36  ;;  %v1016_v34 = vld [vmem:[%s1529_s6] ss:$0 sm:$0xff] }
  0xf5   : > { %v523_v41 = vmul.f32 0.5, %v515_v37  ;;  %v524_v42 = vmul.f32 0.5, %v516_v38  ;;  %v569_v43 = vmul.f32 %v561_v39, %v529_v27  ;;  %v570_v44 = vmul.f32 %v562_v40, %v530_v28 }
  0xf6   : > { %v442_v45 = vpop.f32.mrf.mxu0  ;;  %v471_v46 = vpop.f32.mrf.mxu1 }
  0xf7   : > { %577 = vst [vmem:[#allocation2 + $0x30] sm:$0xff] %v569_v43  ;;  %v487_v47 = vmul.f32 %v1431_v7, %v442_v45  ;;  %v488_v48 = vmul.f32 %v1433_v8, %v471_v46  ;;  %v531_v49 = vadd.f32 %v523_v41, %v507_v29  ;;  %v532_v50 = vadd.f32 %v524_v42, %v508_v30  ;;  %v1015_v29 = vld [vmem:[%s1528_s5] ss:$0 sm:$0xff]  ;;  %v692_v45 = vld [vmem:[#allocation3 + $0x18] sm:$0xff] }
  0xf8   : > { %578 = vst [vmem:[#allocation2] sm:$0xff] %v570_v44 }
  0xf9   : > { %v501_v53 = vadd.f32 %v1435_v9, %v487_v47  ;;  %v502_v54 = vadd.f32 %v1437_v10, %v488_v48  ;;  %vm539_vm2 = vcmp.ge.f32.partialorder %v531_v49, 0.5  ;;  %vm540_vm3 = vcmp.ge.f32.partialorder %v532_v50, 0.5 }
  0xfa   : > { %v888_v55 = vsel %vm539_vm2, 1.0, %v1237_v33  ;;  %895 = vmatmul.msk.f32.gmra.mxu2 %vm539_vm2, %v1238_v35  ;;  %v889_v56 = vsel %vm540_vm3, 1.0, %v1237_v33  ;;  %899 = vmatmul.msk.f32.gmra.mxu3 %vm540_vm3, %v1238_v35 }
  0xfb   : > { %v517_v57 = vsub.f32 %v501_v53, %v509_v51  ;;  %v518_v58 = vsub.f32 %v502_v54, %v510_v52  ;;  %v563_v59 = vsub.f32 1.0, %v888_v55  ;;  %v564_v60 = vsub.f32 1.0, %v889_v56 }
  0xfd   : > { %v525_v61 = vmul.f32 0.5, %v517_v57  ;;  %v526_v62 = vmul.f32 0.5, %v518_v58  ;;  %v571_v63 = vmul.f32 %v563_v59, %v531_v49  ;;  %v572_v0 = vmul.f32 %v564_v60, %v532_v50  ;;  %v693_v57 = vld [vmem:[#allocation3 + $0x10] sm:$0xff] }
  0xfe   : > { %v445_v1 = vpop.f32.mrf.mxu0  ;;  %v474_v2 = vpop.f32.mrf.mxu1 }
  0xff   : > { %579 = vst [vmem:[#allocation2 + $0x18] sm:$0xff] %v571_v63  ;;  %v489_v3 = vmul.f32 %v1431_v7, %v445_v1  ;;  %v490_v4 = vmul.f32 %v1433_v8, %v474_v2  ;;  %v533_v5 = vadd.f32 %v525_v61, %v509_v51  ;;  %v534_v6 = vadd.f32 %v526_v62, %v510_v52 }
 0x100   : > { %580 = vst [vmem:[#allocation2 + $0x10] sm:$0xff] %v572_v0 }
 0x101   : > { %v503_v13 = vadd.f32 %v1435_v9, %v489_v3  ;;  %v504_v14 = vadd.f32 %v1437_v10, %v490_v4  ;;  %vm541_vm4 = vcmp.ge.f32.partialorder %v533_v5, 0.5  ;;  %vm542_vm5 = vcmp.ge.f32.partialorder %v534_v6, 0.5 }
 0x102   : > { %v890_v15 = vsel %vm541_vm4, 1.0, %v1237_v33  ;;  %896 = vmatmul.msk.f32.gmra.mxu2 %vm541_vm4, %v1238_v35  ;;  %v891_v16 = vsel %vm542_vm5, 1.0, %v1237_v33  ;;  %900 = vmatmul.msk.f32.gmra.mxu3 %vm542_vm5, %v1238_v35 }
 0x103   : > { %v519_v7 = vsub.f32 %v503_v13, %v511_v11  ;;  %v520_v8 = vsub.f32 %v504_v14, %v512_v12  ;;  %v565_v17 = vsub.f32 1.0, %v890_v15  ;;  %v566_v18 = vsub.f32 1.0, %v891_v16 }
 0x105   : > { %v527_v19 = vmul.f32 0.5, %v519_v7  ;;  %v528_v20 = vmul.f32 0.5, %v520_v8  ;;  %v573_v21 = vmul.f32 %v565_v17, %v533_v5  ;;  %v574_v9 = vmul.f32 %v566_v18, %v534_v6  ;;  %v694_v5 = vld [vmem:[#allocation3 + $0x8] sm:$0xff] }
 0x107   : > { %581 = vst [vmem:[#allocation2 + $0x8] sm:$0xff] %v573_v21  ;;  %v535_v10 = vadd.f32 %v527_v19, %v511_v11  ;;  %v536_v22 = vadd.f32 %v528_v20, %v512_v12 }
 0x108   : > { %582 = vst [vmem:[#allocation2 + $0x20] sm:$0xff] %v574_v9 }
 0x109   : > { %vm543_vm6 = vcmp.ge.f32.partialorder %v535_v10, 0.5  ;;  %vm544_vm7 = vcmp.ge.f32.partialorder %v536_v22, 0.5 }
 0x10a   : > { %v892_v23 = vsel %vm543_vm6, 1.0, %v1237_v33  ;;  %897 = vmatmul.msk.f32.gmra.mxu2 %vm543_vm6, %v1238_v35  ;;  %v893_v24 = vsel %vm544_vm7, 1.0, %v1237_v33  ;;  %901 = vmatmul.msk.f32.gmra.mxu3 %vm544_vm7, %v1238_v35  ;;  %v691_v35 = vld [vmem:[#allocation3] sm:$0xff] }
 0x10b   : > { %v567_v25 = vsub.f32 1.0, %v892_v23  ;;  %v568_v26 = vsub.f32 1.0, %v893_v24 }
 0x10d   : > { %v575_v27 = vmul.f32 %v567_v25, %v535_v10  ;;  %v576_v28 = vmul.f32 %v568_v26, %v536_v22 }
 0x10f   : > { %583 = vst [vmem:[#allocation2 + $0x28] sm:$0xff] %v575_v27 }
 0x110   : > { %584 = vst [vmem:[#allocation2 + $0x38] sm:$0xff] %v576_v28 }
 0x175   : > { %v634_v30 = vpop.f32.mrf.mxu2  ;;  %v663_v31 = vpop.f32.mrf.mxu3 }
 0x176   : > { %v664_v32 = vadd.f32 %v663_v31, %v634_v30 }
 0x178   : > { %v679_v36 = vmul.f32 %v1015_v29, %v664_v32 }
 0x17a   : > { %v687_v37 = vadd.f32 %v1016_v34, %v679_v36 }
 0x17c   : > { %v695_v38 = vsub.f32 %v687_v37, %v691_v35 }
 0x17d   : > { %v637_v39 = vpop.f32.mrf.mxu2  ;;  %v666_v40 = vpop.f32.mrf.mxu3 }
 0x17e   : > { %v699_v41 = vmul.f32 0.5, %v695_v38  ;;  %v667_v42 = vadd.f32 %v666_v40, %v637_v39 }
 0x180   : > { %v703_v43 = vadd.f32 %v699_v41, %v691_v35  ;;  %v680_v44 = vmul.f32 %v1015_v29, %v667_v42 }
 0x182   : > { %vm707_vm8 = vcmp.ge.f32.partialorder %v703_v43, 0.5  ;;  %v688_v46 = vadd.f32 %v1016_v34, %v680_v44 }
 0x183   : > { %v902_v47 = vsel %vm707_vm8, 1.0, %v1237_v33 }
 0x184   : > { %v719_v48 = vsub.f32 1.0, %v902_v47  ;;  %731 = vst [vmem:[%s1421_s2] sm:$0xff] %v902_v47  ;;  %v696_v49 = vsub.f32 %v688_v46, %v692_v45 }
 0x185   : > { %v640_v50 = vpop.f32.mrf.mxu2  ;;  %v669_v51 = vpop.f32.mrf.mxu3 }
 0x186   : > { %v723_v52 = vmul.f32 %v719_v48, %v703_v43  ;;  %v700_v53 = vmul.f32 0.5, %v696_v49  ;;  %v670_v54 = vadd.f32 %v669_v51, %v640_v50 }
 0x188   : > { %727 = vst [vmem:[#allocation3] sm:$0xff] %v723_v52  ;;  %v704_v55 = vadd.f32 %v700_v53, %v692_v45  ;;  %v681_v56 = vmul.f32 %v1015_v29, %v670_v54 }
 0x18a   : > { %vm708_vm9 = vcmp.ge.f32.partialorder %v704_v55, 0.5  ;;  %v689_v58 = vadd.f32 %v1016_v34, %v681_v56 }
 0x18b   : > { %v903_v59 = vsel %vm708_vm9, 1.0, %v1237_v33 }
 0x18c   : > { %v720_v60 = vsub.f32 1.0, %v903_v59  ;;  %732 = vst [vmem:[%s1421_s2 + $0x8] sm:$0xff] %v903_v59  ;;  %v697_v61 = vsub.f32 %v689_v58, %v693_v57 }
 0x18d   : > { %v643_v62 = vpop.f32.mrf.mxu2  ;;  %v672_v63 = vpop.f32.mrf.mxu3 }
 0x18e   : > { %v724_v0 = vmul.f32 %v720_v60, %v704_v55  ;;  %v701_v1 = vmul.f32 0.5, %v697_v61  ;;  %v673_v2 = vadd.f32 %v672_v63, %v643_v62 }
 0x190   : > { %728 = vst [vmem:[#allocation3 + $0x18] sm:$0xff] %v724_v0  ;;  %v705_v3 = vadd.f32 %v701_v1, %v693_v57  ;;  %v682_v4 = vmul.f32 %v1015_v29, %v673_v2 }
 0x192   : > { %vm709_vm10 = vcmp.ge.f32.partialorder %v705_v3, 0.5  ;;  %v690_v6 = vadd.f32 %v1016_v34, %v682_v4 }
 0x193   : > { %v904_v11 = vsel %vm709_vm10, 1.0, %v1237_v33 }
 0x194   : > { %v721_v12 = vsub.f32 1.0, %v904_v11  ;;  %733 = vst [vmem:[%s1421_s2 + $0x10] sm:$0xff] %v904_v11  ;;  %v698_v13 = vsub.f32 %v690_v6, %v694_v5 }
 0x196   : > { %v725_v14 = vmul.f32 %v721_v12, %v705_v3  ;;  %v702_v15 = vmul.f32 0.5, %v698_v13 }
 0x198   : > { %729 = vst [vmem:[#allocation3 + $0x10] sm:$0xff] %v725_v14  ;;  %v706_v16 = vadd.f32 %v702_v15, %v694_v5 }
 0x19a   : > { %vm710_vm11 = vcmp.ge.f32.partialorder %v706_v16, 0.5 }
 0x19b   : > { %v905_v7 = vsel %vm710_vm11, 1.0, %v1237_v33 }
 0x19c   : > { %v722_v8 = vsub.f32 1.0, %v905_v7  ;;  %734 = vst [vmem:[%s1421_s2 + $0x18] sm:$0xff] %v905_v7 }
 0x19d   : > { %1164 = shalt.err (!%p1161_p13)
}
 0x19e   : > { %s1239_s18 = smov 128   ;;  %s1240_s2 = smov 8   ;;  %v726_v33 = vmul.f32 %v722_v8, %v706_v16 }
 0x19f   : > { %927 = dma.vmem_to_hbm [thread:$0]  (%p1372_p0), %s751_s17, 512, %s753_s20, %s736_s27, %s1239_s18, %s1239_s18, %s1240_s2  }
 0x1a0   : > { %730 = vst [vmem:[#allocation3 + $0x8] sm:$0xff] %v726_v33 }
 0x1a1 PF: > { %p954_p3 = scmp.ge.s32.totalorder %s1227_s29, 2  ;;  %s767_s16 = sand.u32 1, %s1207_s24  }
 0x1a2   : > { %s768_s15 = scalar_lea.sflag [#allocation6], %s767_s16 }
 0x1a3   : > { %p944_p5 = pnand %p954_p3, %p1330_p6 }
 0x1a5   : > { %p945_p7 = pneg %p944_p5 }
 0x1a7   : > { %1202 = dma.done.wait (%p945_p7), %s768_s15, 512  }
 0x1a8   : > { %1204 = vsyncadd (%p945_p7), %s768_s15, 4294966784  ;;  %s25_s29 = sadd.s32 1, %s1227_s29   ;;  %s1554_s22 = sld [smem:[#allocation18_spill]] }
 0x1a9   : > { %p22_p2 = scmp.ge.s32.totalorder %s25_s29, 6   ;;  %s1555_s24 = smov %s1211_s25 }
 0x1aa   : > { %s1556_s25 = smov %s1215_s26  ;;  %s1557_s26 = smov %s1388_s10 }
 0x1ab   : > { %s1558_s27 = smov %s1223_s28  ;;  %24 = sbr.rel (!%p22_p2) target bundleno = 12 (0xc), region = 109 }
 0x1ae   : > { %s1559_s28 = smov %s1554_s22 }
 0x1b0   :  { %774 = vsyncpa [#allocation5], 1 }
 0x1b1   :  { %776 = vsyncpa [#allocation5 + $0x1], 1 }
 0x1b2   :  { %777 = vsyncpa [#allocation8], 1 }
 0x1b3   :  { %778 = vsyncpa [#allocation11], 1 }
 0x1b4   :  { %779 = vsyncpa [#allocation6], 1 }
 0x1b5   :  { %781 = vsyncpa [#allocation6 + $0x1], 1 }

</bundles_post_ra>
